<compile_context>
chip_gen: v7x
topology: tpu7x:2x2x1
jax: 0.10.0
libtpu: 0.0.40
codegen_flags: <defaults>
</compile_context>

<pallas_src>
import functools

import jax
import jax.numpy as jnp
from jax.experimental import pallas as pl
from jax.experimental.pallas import tpu as pltpu

ALPHA = 0.5
BETA = 0.5

_SUB = 8      # sublanes per vreg
_LANE = 128   # lanes per vreg


def _tversky_partials_kernel(x_ref, t_ref, out_ref, *, block_rows, total_rows):
    """One grid step: write an (8, 384) block of column partial sums [p*t | p | t]."""
    # In-kernel cast + sigmoid: hidden under the HBM DMA of the next block.
    xf = x_ref[...].astype(jnp.float32)
    p = 0.5 * (jnp.tanh(0.5 * xf) + 1.0)          # == sigmoid(x); single EUP transcendental
    t = t_ref[...].astype(jnp.float32)

    ones = jnp.ones((_SUB, block_rows), jnp.float32)
    dn = (((1,), (0,)), ((), ()))                 # contract block_rows (leading axis of rhs)

    def _reduce(pv, tv):
        # Column sums via a ones-contraction on the otherwise-idle MXU; all 8 result
        # rows are identical (finalize reads row 0).  One lane-dense (8, 384) store.
        pt = pv * tv
        out_ref[:, 0 * _LANE:1 * _LANE] = jax.lax.dot_general(
            ones, pt, dn, preferred_element_type=jnp.float32)
        out_ref[:, 1 * _LANE:2 * _LANE] = jax.lax.dot_general(
            ones, pv, dn, preferred_element_type=jnp.float32)
        out_ref[:, 2 * _LANE:3 * _LANE] = jax.lax.dot_general(
            ones, tv, dn, preferred_element_type=jnp.float32)

    rem = total_rows % block_rows                 # static Python int
    if rem == 0:
        _reduce(p, t)
    else:
        i = pl.program_id(0)
        last = pl.num_programs(0) - 1

        @pl.when(i != last)
        def _():
            _reduce(p, t)

        @pl.when(i == last)
        def _():
            # Final partial block: rows >= rem contain stale/undefined VMEM.  Mask the
            # VALUES to 0.0 before the multiply and the contraction (NaN/Inf-safe).
            row = jax.lax.broadcasted_iota(jnp.int32, (block_rows, _LANE), 0)
            valid = row < rem
            _reduce(jnp.where(valid, p, 0.0), jnp.where(valid, t, 0.0))


@functools.partial(jax.jit,
                   static_argnames=("smooth", "alpha", "beta", "max_block_rows"))
def tversky_loss(inputs, targets, smooth=1.0, alpha=ALPHA, beta=BETA,
                 max_block_rows=None):
    x = inputs.reshape(-1)            # native dtype; flatten is a zero-copy bitcast
    t = targets.reshape(-1)
    n = x.shape[0]

    rows = n // _LANE                 # body rows processed by the kernel
    body = rows * _LANE

    # Tail (< 128 elements): fold into the sums in plain JAX instead of padding.
    if body != n:
        xt = x[body:].astype(jnp.float32)
        tt = t[body:].astype(jnp.float32)
        p_tail = jax.nn.sigmoid(xt)
        tail = (jnp.sum(p_tail * tt), jnp.sum(p_tail), jnp.sum(tt))
    else:
        tail = (0.0, 0.0, 0.0)

    if rows == 0:
        tp, sp, st = tail
    else:
        if body != n:
            x2 = x[:body].reshape(rows, _LANE)
            t2 = t[:body].reshape(rows, _LANE)
        else:
            x2 = x.reshape(rows, _LANE)          # zero-copy
            t2 = t.reshape(rows, _LANE)

        if max_block_rows is None:
            # Kernel is HBM-bound on all generations; narrower dtypes need bigger
            # blocks to keep the per-step fixed cost amortized at v7x bandwidth.
            narrow = x.dtype.itemsize < 4 and t.dtype.itemsize < 4
            max_block_rows = 8192 if narrow else 4096
        block_rows = min(max_block_rows, rows)   # multiple of 8, or == full row dim
        num_blocks = pl.cdiv(rows, block_rows)

        in_spec = pl.BlockSpec((block_rows, _LANE), lambda i: (i, 0))
        out_spec = pl.BlockSpec((_SUB, 3 * _LANE), lambda i: (i, 0))

        kernel = functools.partial(_tversky_partials_kernel,
                                   block_rows=block_rows, total_rows=rows)
        in_bytes = body * (x.dtype.itemsize + t.dtype.itemsize)
        out_bytes = num_blocks * _SUB * 3 * _LANE * 4

        parts = pl.pallas_call(
            kernel,
            out_shape=jax.ShapeDtypeStruct((num_blocks * _SUB, 3 * _LANE), jnp.float32),
            grid=(num_blocks,),
            in_specs=[in_spec, in_spec],
            out_specs=out_spec,
            compiler_params=pltpu.CompilerParams(
                dimension_semantics=("parallel",),     # independent blocks -> 2 TCs on v7x
                vmem_limit_bytes=32 * 1024 * 1024,     # covers double-buffered big blocks
            ),
            cost_estimate=pl.CostEstimate(
                flops=60 * body, transcendentals=body,
                bytes_accessed=in_bytes + out_bytes),
        )(x2, t2)

        # Finalize on a few KB in plain JAX: rows 1..7 of each block duplicate row 0.
        row0 = parts.reshape(num_blocks, _SUB, 3, _LANE)[:, 0]   # (num_blocks, 3, 128)
        sums = jnp.sum(row0, axis=(0, 2))                        # [sum(p*t), sum(p), sum(t)]
        tp = sums[0] + tail[0]
        sp = sums[1] + tail[1]
        st = sums[2] + tail[2]

    fp = sp - tp                        # sum((1 - t) * p)
    fn = st - tp                        # sum(t * (1 - p))
    tversky = (tp + smooth) / (tp + alpha * fp + beta * fn + smooth)
    return 1.0 - tversky


def _tversky_ref(inputs, targets, smooth=1.0, alpha=ALPHA, beta=BETA):
    p = jax.nn.sigmoid(inputs.reshape(-1).astype(jnp.float32))
    t = targets.reshape(-1).astype(jnp.float32)
    TP = jnp.sum(p * t)
    FP = jnp.sum((1.0 - t) * p)
    FN = jnp.sum(t * (1.0 - p))
    return 1.0 - (TP + smooth) / (TP + alpha * FP + beta * FN + smooth)


if __name__ == "__main__":
    key = jax.random.PRNGKey(0)
    k1, k2, k3, k4, k5, k6 = jax.random.split(key, 6)

    # 1) Module-style NCHW logits + binary float targets (aligned, zero-copy path).
    x = jax.random.normal(k1, (2, 4, 16, 16), dtype=jnp.float32)
    tgt = (jax.random.uniform(k2, (2, 4, 16, 16)) > 0.5).astype(jnp.float32)
    loss = tversky_loss(x, tgt)
    jax.block_until_ready(loss)
    ref = _tversky_ref(x, tgt)
    assert jnp.allclose(loss, ref, atol=1e-4, rtol=1e-4), (loss, ref)

    # 2) Ragged element count (not a multiple of 128): exercises the plain-JAX tail.
    xr = jax.random.normal(k3, (2, 3, 11, 7), dtype=jnp.float32)
    tr = (jax.random.uniform(k4, (2, 3, 11, 7)) > 0.5).astype(jnp.float32)
    loss_r = tversky_loss(xr, tr)
    jax.block_until_ready(loss_r)
    ref_r = _tversky_ref(xr, tr)
    assert jnp.allclose(loss_r, ref_r, atol=1e-4, rtol=1e-4), (loss_r, ref_r)

    # 3) bf16 inputs + forced small blocks: multi-block grid with a partial (masked)
    #    final block and the tail path, all exercised on a small array.
    xb = jax.random.normal(k5, (2, 4, 40, 33), dtype=jnp.bfloat16)
    tb = (jax.random.uniform(k6, (2, 4, 40, 33)) > 0.5).astype(jnp.bfloat16)
    loss_b = tversky_loss(xb, tb, max_block_rows=16)
    jax.block_until_ready(loss_b)
    ref_b = _tversky_ref(xb, tb)
    assert jnp.allclose(loss_b, ref_b, atol=1e-4, rtol=1e-4), (loss_b, ref_b)

    print("KERNEL_OK")
</pallas_src>

<mosaic_0001>
module attributes {stable_mosaic.version = 11 : i64} {
  func.func @_tversky_partials_kernel(%arg0: i32, %arg1: memref<16x128xf32, #tpu.memory_space<vmem>>, %arg2: memref<16x128xf32, #tpu.memory_space<vmem>>, %arg3: memref<8x384xf32, #tpu.memory_space<vmem>>) attributes {dimension_semantics = [#tpu.dimension_semantics<parallel>], iteration_bounds = array<i64: 1>, scalar_prefetch = 0 : i64, scratch_operands = 0 : i64, tpu.core_type = #tpu.core_type<tc>, window_params = [{transform_indices = @transform_0, window_bounds = array<i64: 16, 128>}, {transform_indices = @transform_1, window_bounds = array<i64: 16, 128>}, {transform_indices = @transform_2, window_bounds = array<i64: 8, 384>}]} {
    %c0 = arith.constant 0 : index
    %c0_0 = arith.constant 0 : index
    %0 = vector.load %arg1[%c0, %c0_0] : memref<16x128xf32, #tpu.memory_space<vmem>>, vector<16x128xf32>
    %cst = arith.constant 5.000000e-01 : f32
    %1 = vector.broadcast %cst : f32 to vector<16x128xf32>
    %2 = arith.mulf %1, %0 : vector<16x128xf32>
    %3 = math.tanh %2 : vector<16x128xf32>
    %cst_1 = arith.constant 1.000000e+00 : f32
    %4 = vector.broadcast %cst_1 : f32 to vector<16x128xf32>
    %5 = arith.addf %3, %4 : vector<16x128xf32>
    %cst_2 = arith.constant 5.000000e-01 : f32
    %6 = vector.broadcast %cst_2 : f32 to vector<16x128xf32>
    %7 = arith.mulf %6, %5 : vector<16x128xf32>
    %c0_3 = arith.constant 0 : index
    %c0_4 = arith.constant 0 : index
    %8 = vector.load %arg2[%c0_3, %c0_4] : memref<16x128xf32, #tpu.memory_space<vmem>>, vector<16x128xf32>
    %cst_5 = arith.constant 1.000000e+00 : f32
    %9 = vector.broadcast %cst_5 : f32 to vector<8x16xf32>
    %10 = arith.mulf %7, %8 : vector<16x128xf32>
    %cst_6 = arith.constant dense<0.000000e+00> : vector<8x128xf32>
    %11 = tpu.matmul %9, %10, %cst_6 {dimension_numbers = #tpu.dot_dimension_numbers<[1], [0], [0], [1], [0, 0, 1, 1], [], []>} : vector<8x16xf32>, vector<16x128xf32>, vector<8x128xf32> -> vector<8x128xf32>
    %c0_7 = arith.constant 0 : index
    %c0_8 = arith.constant 0 : index
    %12 = vector.load %arg3[%c0_7, %c0_8] : memref<8x384xf32, #tpu.memory_space<vmem>>, vector<8x128xf32>
    tpu.vector_store %arg3[%c0_7, %c0_8], %11 {strides = array<i32>} : memref<8x384xf32, #tpu.memory_space<vmem>>, vector<8x128xf32>,
    %cst_9 = arith.constant dense<0.000000e+00> : vector<8x128xf32>
    %13 = tpu.matmul %9, %7, %cst_9 {dimension_numbers = #tpu.dot_dimension_numbers<[1], [0], [0], [1], [0, 0, 1, 1], [], []>} : vector<8x16xf32>, vector<16x128xf32>, vector<8x128xf32> -> vector<8x128xf32>
    %c0_10 = arith.constant 0 : index
    %c128 = arith.constant 128 : index
    %14 = vector.load %arg3[%c0_10, %c128] : memref<8x384xf32, #tpu.memory_space<vmem>>, vector<8x128xf32>
    tpu.vector_store %arg3[%c0_10, %c128], %13 {strides = array<i32>} : memref<8x384xf32, #tpu.memory_space<vmem>>, vector<8x128xf32>,
    %cst_11 = arith.constant dense<0.000000e+00> : vector<8x128xf32>
    %15 = tpu.matmul %9, %8, %cst_11 {dimension_numbers = #tpu.dot_dimension_numbers<[1], [0], [0], [1], [0, 0, 1, 1], [], []>} : vector<8x16xf32>, vector<16x128xf32>, vector<8x128xf32> -> vector<8x128xf32>
    %c0_12 = arith.constant 0 : index
    %c256 = arith.constant 256 : index
    %16 = vector.load %arg3[%c0_12, %c256] : memref<8x384xf32, #tpu.memory_space<vmem>>, vector<8x128xf32>
    tpu.vector_store %arg3[%c0_12, %c256], %15 {strides = array<i32>} : memref<8x384xf32, #tpu.memory_space<vmem>>, vector<8x128xf32>,
    return
  }
  func.func @transform_0(%arg0: i32) -> (i32, i32) {
    %c0_i32 = arith.constant 0 : i32
    %c0_i32_0 = arith.constant 0 : i32
    return %arg0, %c0_i32 : i32, i32
  }
  func.func @transform_1(%arg0: i32) -> (i32, i32) {
    %c0_i32 = arith.constant 0 : i32
    %c0_i32_0 = arith.constant 0 : i32
    return %arg0, %c0_i32 : i32, i32
  }
  func.func @transform_2(%arg0: i32) -> (i32, i32) {
    %c0_i32 = arith.constant 0 : i32
    %c0_i32_0 = arith.constant 0 : i32
    return %arg0, %c0_i32 : i32, i32
  }
}

</mosaic_0001>

<bundles_post_ra>
// kernel: tversky_loss.1
= control target key start
LH: loop header
LB: loop body
LE: loop exit
PB: predicated region body
PF: predicated region fallthrough
CT: control target
= control target key end

     0   :  { %v296_v0 = vmov 0.0|0.0   ;;  %vm297_vm0 = vmmov 0   ;;  %v298_v3 = vmov 0.0   ;;  %vm25_vm1 = vcmask 130048   ;;  %s339_s0 = inlined_call_operand.vmem [shape: f32[16,128], index: 0, kind: input, shape index: {}]   ;;  %s340_s1 = inlined_call_operand.vmem [shape: f32[16,128], index: 1, kind: input, shape index: {}]   ;;  %s341_s2 = inlined_call_operand.vmem [shape: f32[8,384], index: 2, kind: output, shape index: {}]  }
   0x1   :  { %279 = vmatprep.subr.bf16.mxu0 %v296_v0  ;;  %v11_v1 = vld [vmem:[%s339_s0] sm:$0xff]  ;;  %v12_v2 = vld [vmem:[%s339_s0 + $0x8] sm:$0xff]  ;;  %262 = vmatprep.mubr.msk.f32.mxu0 %vm297_vm0, %v298_v3  ;;  %v299_v19 = vmov 1.0  }
   0x2   :  { %v13_v4 = vmul.f32 0.5, %v11_v1  ;;  %v14_v5 = vmul.f32 0.5, %v12_v2  ;;  %282 = vmatprep.subr.bf16.mxu1 %v296_v0  ;;  %269 = vmatprep.mubr.msk.f32.mxu1 %vm297_vm0, %v298_v3  ;;  %v21_v10 = vld [vmem:[%s340_s1] sm:$0xff]  ;;  %v22_v12 = vld [vmem:[%s340_s1 + $0x8] sm:$0xff] }
   0x3   :  { %v286_v18 = vpack.c.bf16 %v22_v12, %v21_v10 }
   0x4   :  { %292 = vtanh.f32 %v13_v4 }
   0x5   :  { %294 = vtanh.f32 %v14_v5 }
   0xe   :  { %v293_v6 = vpop.eup %292 }
   0xf   :  { %v295_v7 = vpop.eup %294  ;;  %v17_v8 = vadd.f32 1.0, %v293_v6 }
  0x10   :  { %v18_v9 = vadd.f32 1.0, %v295_v7 }
  0x11   :  { %v19_v11 = vmul.f32 0.5, %v17_v8 }
  0x12   :  { %v20_v13 = vmul.f32 0.5, %v18_v9 }
  0x13   :  { %v23_v14 = vmul.f32 %v21_v10, %v19_v11 }
  0x14   :  { %v24_v15 = vmul.f32 %v22_v12, %v20_v13  ;;  %v283_v16 = vpack.c.bf16 %v20_v13, %v19_v11 }
  0x16   :  { %v280_v17 = vpack.c.bf16 %v24_v15, %v23_v14  ;;  %284 = vmatpush3.bf16.msra.mxu1 %v283_v16 }
  0x18   :  { %281 = vmatpush3.bf16.msra.mxu0 %v280_v17 }
  0x19   :  { %285 = vmatprep.subr.bf16.mxu0 %v296_v0  ;;  %270 = vmatmul.mubr.msk.f32.vlgmr.msra.gmra.mrb[0].mxu1 %vm25_vm1, %v299_v19 }
  0x1b   :  { %263 = vmatmul.mubr.msk.f32.vlgmr.msra.gmra.mrb[0].mxu0 %vm25_vm1, %v299_v19 }
  0x1c   :  { %287 = vmatpush3.bf16.msra.mxu0 %v286_v18  ;;  %276 = vmatprep.mubr.msk.f32.mxu0 %vm297_vm0, %v298_v3 }
  0x1f   :  { %277 = vmatmul.mubr.msk.f32.vlgmr.msra.gmra.mrb[2].mxu0 %vm25_vm1, %v299_v19 }
  0xec   :  { %v166_v20 = vpop.f32.mrb[0].mxu1 }
  0xed   :  { %170 = vst [vmem:[%s341_s2 + $0x8] sm:$0xff] %v166_v20  ;;  %v271_v21 = vpop.f32.mrb[1].mxu1 }
  0xee   :  { %v95_v22 = vpop.f32.mrb[0].mxu0 }
  0xef   :  { %99 = vst [vmem:[%s341_s2] sm:$0xff] %v95_v22  ;;  %v264_v23 = vpop.f32.mrb[1].mxu0 }
  0xf2   :  { %v237_v24 = vpop.f32.mrb[2].mxu0 }
  0xf3   :  { %241 = vst [vmem:[%s341_s2 + $0x10] sm:$0xff] %v237_v24  ;;  %v278_v25 = vpop.f32.mrb[3].mxu0 }

</bundles_post_ra>
